<compile_context>
chip_gen: v6e
topology: v6e:2x2x1
jax: 0.10.0
libtpu: 0.0.40
codegen_flags: <defaults>
</compile_context>

<pallas_src>
import jax
import jax.numpy as jnp
from jax.experimental import pallas as pl
from jax.experimental.pallas import tpu as pltpu

OUT_PAD = 128  # pad the 10-wide output layer to a full 128-lane slab


def mlp_kernel(x_ref, w1_ref, b1_ref, w2_ref, b2_ref, w3_ref, b3_ref, o_ref):
    # x_ref: (TB, 784) f32   w1: (784, 512) bf16   b1: (1, 512) f32
    # w2:    (512, 128) bf16  b2: (1, 128) f32
    # w3:    (128, 128) bf16 (zero-padded cols 10..127)  b3: (1, 128) f32
    # o_ref: (TB, 128) bf16
    x = x_ref[...].astype(jnp.bfloat16)            # f32 -> bf16 in-kernel (VPU, hides under MXU)

    h1 = jnp.dot(x, w1_ref[...], preferred_element_type=jnp.float32) + b1_ref[...]
    h1 = jnp.maximum(h1, 0.0)                      # ReLU  (dropout = identity, eval mode)

    h2 = jnp.dot(h1.astype(jnp.bfloat16), w2_ref[...],
                 preferred_element_type=jnp.float32) + b2_ref[...]
    h2 = jnp.maximum(h2, 0.0)                      # ReLU  (dropout = identity, eval mode)

    out = jnp.dot(h2.astype(jnp.bfloat16), w3_ref[...],
                  preferred_element_type=jnp.float32) + b3_ref[...]
    o_ref[...] = out.astype(o_ref.dtype)


def _round_up(n, m):
    return -(-n // m) * m


def _num_tensorcores():
    """Best-effort TC-per-chip detection: 2 on v7x, 1 on v5e/v6e (and on failure)."""
    try:
        kind = jax.devices()[0].device_kind.lower()
    except Exception:
        return 1
    return 2 if "v7" in kind else 1


def prepare_params(params):
    """One-time weight prep: (in, out)-layout weights -> bf16, W3/b3 padded to 128 lanes."""
    w1, b1, w2, b2, w3, b3 = params
    w3p = jnp.zeros((128, OUT_PAD), jnp.float32).at[:, :10].set(w3)
    b3p = jnp.zeros((1, OUT_PAD), jnp.float32).at[:, :10].set(b3)
    return (w1.astype(jnp.bfloat16), b1,
            w2.astype(jnp.bfloat16), b2,
            w3p.astype(jnp.bfloat16), b3p)


def mlp_forward(x_nchw, prepared, *, tb=1024):
    """x_nchw: (B, 1, 28, 28) float32, prepared = prepare_params(params) -> logits (B, 10) f32."""
    w1b, b1, w2b, b2, w3b, b3p = prepared
    B = x_nchw.shape[0]
    x = x_nchw.reshape(B, 28 * 28)                 # same as torch x.view(-1, 784); stays f32

    # Split rows evenly across grid steps (minimal pad waste).  Only force >= 2 (even)
    # steps on 2-TC chips so the "parallel" axis can shard across TensorCores.
    ncores = _num_tensorcores()
    n_steps = max(1, pl.cdiv(B, tb))
    if ncores >= 2:
        n_steps = max(n_steps, 2)
        n_steps += n_steps % 2                     # keep even -> both TCs get work
    tb_eff = _round_up(pl.cdiv(B, n_steps), 16)    # 16-sublane aligned (bf16 output tile)
    Bp = n_steps * tb_eff
    if Bp != B:
        x = jnp.pad(x, ((0, Bp - B), (0, 0)))

    grid = (n_steps,)
    full = lambda i: (0, 0)                        # weights/biases: whole array every step

    out = pl.pallas_call(
        mlp_kernel,
        out_shape=jax.ShapeDtypeStruct((Bp, OUT_PAD), jnp.bfloat16),
        grid_spec=pltpu.PrefetchScalarGridSpec(
            num_scalar_prefetch=0,
            grid=grid,
            in_specs=[
                pl.BlockSpec((tb_eff, 28 * 28), lambda i: (i, 0)),   # x tile (f32)
                pl.BlockSpec((28 * 28, 512), full),                  # W1 (bf16)
                pl.BlockSpec((1, 512), full),                        # b1 (f32)
                pl.BlockSpec((512, 128), full),                      # W2 (bf16)
                pl.BlockSpec((1, 128), full),                        # b2 (f32)
                pl.BlockSpec((128, OUT_PAD), full),                  # W3 padded (bf16)
                pl.BlockSpec((1, OUT_PAD), full),                    # b3 padded (f32)
            ],
            out_specs=pl.BlockSpec((tb_eff, OUT_PAD), lambda i: (i, 0)),
        ),
        compiler_params=pltpu.CompilerParams(
            dimension_semantics=("parallel",),
            vmem_limit_bytes=48 * 1024 * 1024,     # f32 x tiles at tb=1024 exceed v5e's 16 MiB default
        ),
    )(x, w1b, b1, w2b, b2, w3b, b3p)

    return out[:B, :10].astype(jnp.float32)


def init_params(key):
    """Deterministic init; weights stored as (in, out) = torch weight.T."""
    k1, k2, k3, k4, k5, k6 = jax.random.split(key, 6)

    def lin(kw, kb, fan_in, fan_out):
        bound = 1.0 / jnp.sqrt(fan_in)
        w = jax.random.uniform(kw, (fan_in, fan_out), jnp.float32, -bound, bound)
        b = jax.random.uniform(kb, (1, fan_out), jnp.float32, -bound, bound)
        return w, b

    w1, b1 = lin(k1, k2, 28 * 28, 512)
    w2, b2 = lin(k3, k4, 512, 128)
    w3, b3 = lin(k5, k6, 128, 10)
    return (w1, b1, w2, b2, w3, b3)


def reference_forward(x_nchw, params):
    """Pure-JAX f32 reference matching the torch forward (eval mode)."""
    w1, b1, w2, b2, w3, b3 = params
    x = x_nchw.reshape(x_nchw.shape[0], 28 * 28)
    h1 = jnp.maximum(x @ w1 + b1, 0.0)
    h2 = jnp.maximum(h1 @ w2 + b2, 0.0)
    return h2 @ w3 + b3


if __name__ == "__main__":
    key = jax.random.PRNGKey(0)
    kx, kx2, kp = jax.random.split(key, 3)
    params = init_params(kp)
    prepared = prepare_params(params)              # weight prep hoisted out of the forward

    # Small MNIST-shaped batch.
    B = 8
    x = jax.random.normal(kx, (B, 1, 28, 28), jnp.float32)   # NCHW like torch MNIST
    out = jax.block_until_ready(mlp_forward(x, prepared))
    ref = reference_forward(x, params)
    assert out.shape == (B, 10)
    # bf16 inputs/weights/output with f32 accumulation -> loosened tolerance vs. f32 reference.
    assert jnp.allclose(out, ref, atol=4e-2, rtol=4e-2), "mismatch vs reference (B=8)"

    # Non-multiple batch exercising the even-split padding path (and 2-step grid on v7x).
    B2 = 300
    x2 = jax.random.normal(kx2, (B2, 1, 28, 28), jnp.float32)
    out2 = jax.block_until_ready(mlp_forward(x2, prepared))
    ref2 = reference_forward(x2, params)
    assert out2.shape == (B2, 10)
    assert jnp.allclose(out2, ref2, atol=4e-2, rtol=4e-2), "mismatch vs reference (B=300)"

    print("KERNEL_OK")
</pallas_src>

<mosaic_0001>
module attributes {stable_mosaic.version = 11 : i64} {
  func.func @mlp_kernel(%arg0: i32, %arg1: memref<16x784xf32, #tpu.memory_space<vmem>>, %arg2: memref<784x512xbf16, #tpu.memory_space<vmem>>, %arg3: memref<1x512xf32, #tpu.memory_space<vmem>>, %arg4: memref<512x128xbf16, #tpu.memory_space<vmem>>, %arg5: memref<1x128xf32, #tpu.memory_space<vmem>>, %arg6: memref<128x128xbf16, #tpu.memory_space<vmem>>, %arg7: memref<1x128xf32, #tpu.memory_space<vmem>>, %arg8: memref<16x128xbf16, #tpu.memory_space<vmem>>) attributes {dimension_semantics = [#tpu.dimension_semantics<parallel>], iteration_bounds = array<i64: 1>, scalar_prefetch = 0 : i64, scratch_operands = 0 : i64, tpu.core_type = #tpu.core_type<tc>, window_params = [{transform_indices = @transform_0, window_bounds = array<i64: 16, 784>}, {pipeline_mode = #tpu.pipeline_mode<synchronous>, transform_indices = @transform_1, window_bounds = array<i64: 784, 512>}, {pipeline_mode = #tpu.pipeline_mode<synchronous>, transform_indices = @transform_2, window_bounds = array<i64: 1, 512>}, {pipeline_mode = #tpu.pipeline_mode<synchronous>, transform_indices = @transform_3, window_bounds = array<i64: 512, 128>}, {pipeline_mode = #tpu.pipeline_mode<synchronous>, transform_indices = @transform_4, window_bounds = array<i64: 1, 128>}, {pipeline_mode = #tpu.pipeline_mode<synchronous>, transform_indices = @transform_5, window_bounds = array<i64: 128, 128>}, {pipeline_mode = #tpu.pipeline_mode<synchronous>, transform_indices = @transform_6, window_bounds = array<i64: 1, 128>}, {transform_indices = @transform_7, window_bounds = array<i64: 16, 128>}]} {
    %c0 = arith.constant 0 : index
    %c0_0 = arith.constant 0 : index
    %0 = vector.load %arg1[%c0, %c0_0] : memref<16x784xf32, #tpu.memory_space<vmem>>, vector<16x784xf32>
    %1 = arith.truncf %0 : vector<16x784xf32> to vector<16x784xbf16>
    %c0_1 = arith.constant 0 : index
    %c0_2 = arith.constant 0 : index
    %2 = vector.load %arg2[%c0_1, %c0_2] : memref<784x512xbf16, #tpu.memory_space<vmem>>, vector<784x512xbf16>
    %cst = arith.constant dense<0.000000e+00> : vector<16x512xf32>
    %3 = tpu.matmul %1, %2, %cst {dimension_numbers = #tpu.dot_dimension_numbers<[1], [0], [0], [1], [0, 0, 1, 1], [], []>} : vector<16x784xbf16>, vector<784x512xbf16>, vector<16x512xf32> -> vector<16x512xf32>
    %c0_3 = arith.constant 0 : index
    %c0_4 = arith.constant 0 : index
    %4 = vector.load %arg3[%c0_3, %c0_4] : memref<1x512xf32, #tpu.memory_space<vmem>>, vector<1x512xf32>
    %5 = vector.broadcast %4 : vector<1x512xf32> to vector<16x512xf32>
    %6 = arith.addf %3, %5 : vector<16x512xf32>
    %cst_5 = arith.constant 0.000000e+00 : f32
    %7 = vector.broadcast %cst_5 : f32 to vector<16x512xf32>
    %8 = arith.maximumf %6, %7 : vector<16x512xf32>
    %9 = arith.truncf %8 : vector<16x512xf32> to vector<16x512xbf16>
    %c0_6 = arith.constant 0 : index
    %c0_7 = arith.constant 0 : index
    %10 = vector.load %arg4[%c0_6, %c0_7] : memref<512x128xbf16, #tpu.memory_space<vmem>>, vector<512x128xbf16>
    %cst_8 = arith.constant dense<0.000000e+00> : vector<16x128xf32>
    %11 = tpu.matmul %9, %10, %cst_8 {dimension_numbers = #tpu.dot_dimension_numbers<[1], [0], [0], [1], [0, 0, 1, 1], [], []>} : vector<16x512xbf16>, vector<512x128xbf16>, vector<16x128xf32> -> vector<16x128xf32>
    %c0_9 = arith.constant 0 : index
    %c0_10 = arith.constant 0 : index
    %12 = vector.load %arg5[%c0_9, %c0_10] : memref<1x128xf32, #tpu.memory_space<vmem>>, vector<1x128xf32>
    %13 = vector.broadcast %12 : vector<1x128xf32> to vector<16x128xf32>
    %14 = arith.addf %11, %13 : vector<16x128xf32>
    %cst_11 = arith.constant 0.000000e+00 : f32
    %15 = vector.broadcast %cst_11 : f32 to vector<16x128xf32>
    %16 = arith.maximumf %14, %15 : vector<16x128xf32>
    %17 = arith.truncf %16 : vector<16x128xf32> to vector<16x128xbf16>
    %c0_12 = arith.constant 0 : index
    %c0_13 = arith.constant 0 : index
    %18 = vector.load %arg6[%c0_12, %c0_13] : memref<128x128xbf16, #tpu.memory_space<vmem>>, vector<128x128xbf16>
    %cst_14 = arith.constant dense<0.000000e+00> : vector<16x128xf32>
    %19 = tpu.matmul %17, %18, %cst_14 {dimension_numbers = #tpu.dot_dimension_numbers<[1], [0], [0], [1], [0, 0, 1, 1], [], []>} : vector<16x128xbf16>, vector<128x128xbf16>, vector<16x128xf32> -> vector<16x128xf32>
    %c0_15 = arith.constant 0 : index
    %c0_16 = arith.constant 0 : index
    %20 = vector.load %arg7[%c0_15, %c0_16] : memref<1x128xf32, #tpu.memory_space<vmem>>, vector<1x128xf32>
    %21 = vector.broadcast %20 : vector<1x128xf32> to vector<16x128xf32>
    %22 = arith.addf %19, %21 : vector<16x128xf32>
    %23 = arith.truncf %22 : vector<16x128xf32> to vector<16x128xbf16>
    %c0_17 = arith.constant 0 : index
    %c0_18 = arith.constant 0 : index
    %24 = vector.load %arg8[%c0_17, %c0_18] : memref<16x128xbf16, #tpu.memory_space<vmem>>, vector<16x128xbf16>
    tpu.vector_store %arg8[%c0_17, %c0_18], %23 {strides = array<i32>} : memref<16x128xbf16, #tpu.memory_space<vmem>>, vector<16x128xbf16>,
    return
  }
  func.func @transform_0(%arg0: i32) -> (i32, i32) {
    %c0_i32 = arith.constant 0 : i32
    %c0_i32_0 = arith.constant 0 : i32
    return %arg0, %c0_i32 : i32, i32
  }
  func.func @transform_1(%arg0: i32) -> (i32, i32) {
    %c0_i32 = arith.constant 0 : i32
    %c0_i32_0 = arith.constant 0 : i32
    %c0_i32_1 = arith.constant 0 : i32
    return %c0_i32, %c0_i32_0 : i32, i32
  }
  func.func @transform_2(%arg0: i32) -> (i32, i32) {
    %c0_i32 = arith.constant 0 : i32
    %c0_i32_0 = arith.constant 0 : i32
    %c0_i32_1 = arith.constant 0 : i32
    return %c0_i32, %c0_i32_0 : i32, i32
  }
  func.func @transform_3(%arg0: i32) -> (i32, i32) {
    %c0_i32 = arith.constant 0 : i32
    %c0_i32_0 = arith.constant 0 : i32
    %c0_i32_1 = arith.constant 0 : i32
    return %c0_i32, %c0_i32_0 : i32, i32
  }
  func.func @transform_4(%arg0: i32) -> (i32, i32) {
    %c0_i32 = arith.constant 0 : i32
    %c0_i32_0 = arith.constant 0 : i32
    %c0_i32_1 = arith.constant 0 : i32
    return %c0_i32, %c0_i32_0 : i32, i32
  }
  func.func @transform_5(%arg0: i32) -> (i32, i32) {
    %c0_i32 = arith.constant 0 : i32
    %c0_i32_0 = arith.constant 0 : i32
    %c0_i32_1 = arith.constant 0 : i32
    return %c0_i32, %c0_i32_0 : i32, i32
  }
  func.func @transform_6(%arg0: i32) -> (i32, i32) {
    %c0_i32 = arith.constant 0 : i32
    %c0_i32_0 = arith.constant 0 : i32
    %c0_i32_1 = arith.constant 0 : i32
    return %c0_i32, %c0_i32_0 : i32, i32
  }
  func.func @transform_7(%arg0: i32) -> (i32, i32) {
    %c0_i32 = arith.constant 0 : i32
    %c0_i32_0 = arith.constant 0 : i32
    return %arg0, %c0_i32 : i32, i32
  }
}

</mosaic_0001>

<bundles_post_ra>
// kernel: tpu_custom_call.1
= control target key start
LH: loop header
LB: loop body
LE: loop exit
PB: predicated region body
PF: predicated region fallthrough
CT: control target
= control target key end

     0   :  { %12 = vsyncpa [#allocation3], 0  ;;  %s3081_s0 = inlined_call_operand.hbm [shape: f32[16,784], index: 0, kind: input, shape index: {}]   ;;  %s3082_s1 = inlined_call_operand.hbm [shape: bf16[784,512], index: 1, kind: input, shape index: {}]   ;;  %s3083_s2 = inlined_call_operand.hbm [shape: f32[1,512], index: 2, kind: input, shape index: {}]   ;;  %s3084_s3 = inlined_call_operand.hbm [shape: bf16[512,128], index: 3, kind: input, shape index: {}]   ;;  %s3085_s4 = inlined_call_operand.vmem [shape: f32[1,128], index: 4, kind: input, shape index: {}]   ;;  %s3086_s5 = inlined_call_operand.hbm [shape: bf16[128,128], index: 5, kind: input, shape index: {}]   ;;  %s3087_s6 = inlined_call_operand.vmem [shape: f32[1,128], index: 6, kind: input, shape index: {}]   ;;  %s3088_s7 = inlined_call_operand.hbm [shape: bf16[16,128], index: 7, kind: output, shape index: {}]  }
   0x1   :  { %13 = vsyncpa [#allocation6], 0 }
   0x2   :  { %14 = vsyncpa [#allocation9], 0 }
   0x3   :  { %15 = vsyncpa [#allocation4], 0  ;;  %s2961_s24 = smov [#allocation5]  }
   0x4   :  { %s33_s25 = sshll.u32 %s2961_s24, 4  ;;  %s34_s25 = int_to_ptr.vmem [resolvable:$true] %s33_s25 }
   0x5   :  { %s2841_s26 = scalar_lea.vmem %s34_s25, 25088  ;;  %p2846_p1 = scmp.lt.s32.totalorder %s34_s25, %s34_s25 }
   0x6   :  { %p2842_p0 = scmp.ne.s32.totalorder %s34_s25, %s2841_s26  ;;  %p2847_p2 = scmp.lt.s32.totalorder %s2841_s26, %s2841_s26 }
   0x8   :  { %p2848_p3 = por %p2847_p2, %p2846_p1 }
   0xa   :  { %p2849_p4 = pnand %p2848_p3, %p2842_p0 }
   0xc   :  { %2852 = shalt.err (!%p2849_p4)
}
   0xd   :  { %s2962_s27 = smov 256   ;;  %s2963_s28 = smov 16  }
   0xe   :  { %39 = dma.hbm_to_vmem [thread:$0]  %s3082_s1, 25088, %s34_s25, [#allocation6], %s2962_s27, %s2962_s27, %s2963_s28  }
   0xf   :  { %s2964_s8 = smov [#allocation8]  }
  0x10   :  { %s55_s9 = sshll.u32 %s2964_s8, 4  ;;  %s56_s9 = int_to_ptr.vmem [resolvable:$true] %s55_s9 }
  0x11   :  { %s2861_s10 = scalar_lea.vmem %s56_s9, 4096  ;;  %p2866_p6 = scmp.lt.s32.totalorder %s56_s9, %s56_s9 }
  0x12   :  { %p2862_p5 = scmp.ne.s32.totalorder %s56_s9, %s2861_s10  ;;  %p2867_p7 = scmp.lt.s32.totalorder %s2861_s10, %s2861_s10 }
  0x14   :  { %p2868_p8 = por %p2867_p7, %p2866_p6 }
  0x16   :  { %p2869_p9 = pnand %p2868_p8, %p2862_p5 }
  0x18   :  { %2872 = shalt.err (!%p2869_p9)
}
  0x19   :  { %s2965_s11 = smov 64   ;;  %s2966_s12 = smov 4  }
  0x1a   :  { %61 = dma.hbm_to_vmem [thread:$0]  %s3084_s3, 4096, %s56_s9, [#allocation9], %s2965_s11, %s2965_s11, %s2966_s12  }
  0x1b   :  { %s2967_s1 = smov [#allocation2]  }
  0x1c   :  { %s21_s15 = sshll.u32 %s2967_s1, 4  ;;  %s22_s15 = int_to_ptr.vmem [resolvable:$true] %s21_s15 }
  0x1d   :  { %s2881_s16 = scalar_lea.vmem %s22_s15, 1792  ;;  %p2886_p11 = scmp.lt.s32.totalorder %s22_s15, %s22_s15 }
  0x1e   :  { %p2882_p10 = scmp.ne.s32.totalorder %s22_s15, %s2881_s16  ;;  %p2887_p12 = scmp.lt.s32.totalorder %s2881_s16, %s2881_s16 }
  0x20   :  { %p2888_p13 = por %p2887_p12, %p2886_p11 }
  0x22   :  { %p2889_p0 = pnand %p2888_p13, %p2882_p10 }
  0x24   :  { %2892 = shalt.err (!%p2889_p0)
}
  0x25   :  { %s2968_s17 = smov 896   ;;  %s2969_s18 = smov 56  }
  0x26   :  { %27 = dma.hbm_to_vmem [thread:$0]  %s3081_s0, 1792, %s22_s15, [#allocation3], %s2968_s17, %s2968_s17, %s2969_s18  }
  0x27   :  { %s2970_s21 = smov [#allocation7]   ;;  %s2971_s3 = smov [#allocation10]  }
  0x28   :  { %s46_s22 = sshll.u32 %s2970_s21, 4  ;;  %s69_s23 = sshll.u32 %s2971_s3, 4  ;;  %s47_s22 = int_to_ptr.vmem [resolvable:$true] %s46_s22  ;;  %s70_s23 = int_to_ptr.vmem [resolvable:$true] %s69_s23 }
  0x29   :  { %s2901_s24 = scalar_lea.vmem %s47_s22, 64  ;;  %p2906_p2 = scmp.lt.s32.totalorder %s47_s22, %s47_s22 }
  0x2a   :  { %p2902_p1 = scmp.ne.s32.totalorder %s47_s22, %s2901_s24  ;;  %p2907_p3 = scmp.lt.s32.totalorder %s2901_s24, %s2901_s24 }
  0x2c   :  { %p2908_p4 = por %p2907_p3, %p2906_p2 }
  0x2e   :  { %p2909_p5 = pnand %p2908_p4, %p2902_p1 }
  0x30   :  { %2912 = shalt.err (!%p2909_p5)
}
  0x31   :  { %49 = dma.hbm_to_vmem [thread:$0]  %s3083_s2, 64, %s47_s22, [#allocation6]  }
  0x32   :  { %s2921_s27 = scalar_lea.vmem %s70_s23, 1024  ;;  %p2926_p7 = scmp.lt.s32.totalorder %s70_s23, %s70_s23 }
  0x33   :  { %p2922_p6 = scmp.ne.s32.totalorder %s70_s23, %s2921_s27  ;;  %p2927_p8 = scmp.lt.s32.totalorder %s2921_s27, %s2921_s27 }
  0x35   :  { %p2928_p9 = por %p2927_p8, %p2926_p7 }
  0x37   :  { %p2929_p10 = pnand %p2928_p9, %p2922_p6 }
  0x39   :  { %2932 = shalt.err (!%p2929_p10)
}
  0x3a   :  { %75 = dma.hbm_to_vmem [thread:$0]  %s3086_s5, 1024, %s70_s23, [#allocation9], %s2965_s11, %s2965_s11, %s2966_s12  }
  0x3b   :  { %2953 = dma.done.wait [#allocation3], 1792  }
  0x3c   :  { %2954 = vsyncadd [#allocation3], 4294965504 }
  0x3d   :  { %2955 = dma.done.wait [#allocation6], 25152  }
  0x3e   :  { %2956 = vsyncadd [#allocation6], 4294942144 }
  0x3f   :  { %2957 = dma.done.wait [#allocation9], 5120  }
  0x40   :  { %2958 = vsyncadd [#allocation9], 4294962176  ;;  %v2499_v0 = vld [vmem:[#allocation5 + $0xe4] ss:$16 sps:$4 sm:$0xff]   ;;  %v2503_v2 = vld [vmem:[#allocation5 + $0xe0] ss:$16 sps:$4 sm:$0xff]  }
  0x41   :  { %v2501_v1 = vld [vmem:[#allocation5 + $0x2e4] ss:$16 sps:$4 sm:$0xff]   ;;  %1317 = vmatprep.subr.bf16.mxu0 %v2499_v0  ;;  %v2504_v3 = vld [vmem:[#allocation5 + $0x2e0] ss:$16 sps:$4 sm:$0xff]   ;;  %v95_v46 = vld [vmem:[#allocation2 + $0x8] sm:$0xff]  ;;  %vm1313_vm0 = vcmask 130048  }
  0x42   :  { %1360 = vmatprep.subr.bf16.mxu1 %v2501_v1  ;;  %v2505_v4 = vld [vmem:[#allocation5 + $0xc4] ss:$16 sps:$4 sm:$0xff]   ;;  %1318 = vmatpush1.bf16.msra.mxu0 %v2503_v2  ;;  %v2509_v6 = vld [vmem:[#allocation5 + $0xc0] ss:$16 sps:$4 sm:$0xff]   ;;  %v97_v48 = vld [vmem:[#allocation2 + $0x18] sm:$0xff]  ;;  %vm2974_vm1 = vmmov 0  }
  0x43   :  { %1361 = vmatpush1.bf16.msra.mxu1 %v2504_v3  ;;  %v2507_v5 = vld [vmem:[#allocation5 + $0x2c4] ss:$16 sps:$4 sm:$0xff]   ;;  %1319 = vmatprep.subr.bf16.mxu0 %v2505_v4  ;;  %v2510_v7 = vld [vmem:[#allocation5 + $0x2c0] ss:$16 sps:$4 sm:$0xff]  }
  0x44   :  { %1362 = vmatprep.subr.bf16.mxu1 %v2507_v5  ;;  %v2511_v8 = vld [vmem:[#allocation5 + $0xa4] ss:$16 sps:$4 sm:$0xff]   ;;  %v2515_v10 = vld [vmem:[#allocation5 + $0xa0] ss:$16 sps:$4 sm:$0xff]  }
  0x45   :  { %v2513_v9 = vld [vmem:[#allocation5 + $0x2a4] ss:$16 sps:$4 sm:$0xff]   ;;  %v2516_v11 = vld [vmem:[#allocation5 + $0x2a0] ss:$16 sps:$4 sm:$0xff]  }
  0x46   :  { %1320 = vmatpush1.bf16.msra.mxu0 %v2509_v6  ;;  %v2517_v12 = vld [vmem:[#allocation5 + $0x84] ss:$16 sps:$4 sm:$0xff]   ;;  %v2521_v14 = vld [vmem:[#allocation5 + $0x80] ss:$16 sps:$4 sm:$0xff]  }
  0x47   :  { %1363 = vmatpush1.bf16.msra.mxu1 %v2510_v7  ;;  %1321 = vmatprep.subr.bf16.mxu0 %v2511_v8  ;;  %v2519_v13 = vld [vmem:[#allocation5 + $0x284] ss:$16 sps:$4 sm:$0xff]   ;;  %v2522_v15 = vld [vmem:[#allocation5 + $0x280] ss:$16 sps:$4 sm:$0xff]   ;;  %v101_v7 = vld [vmem:[#allocation2 + $0x38] sm:$0xff] }
  0x48   :  { %1364 = vmatprep.subr.bf16.mxu1 %v2513_v9  ;;  %v2523_v16 = vld [vmem:[#allocation5 + $0x64] ss:$16 sps:$4 sm:$0xff]   ;;  %v2527_v18 = vld [vmem:[#allocation5 + $0x60] ss:$16 sps:$4 sm:$0xff]   ;;  %v103_v9 = vld [vmem:[#allocation2 + $0x48] sm:$0xff] }
  0x49   :  { %v2525_v17 = vld [vmem:[#allocation5 + $0x264] ss:$16 sps:$4 sm:$0xff]   ;;  %v2528_v19 = vld [vmem:[#allocation5 + $0x260] ss:$16 sps:$4 sm:$0xff]  }
  0x4a   :  { %1322 = vmatpush1.bf16.msra.mxu0 %v2515_v10  ;;  %v2529_v20 = vld [vmem:[#allocation5 + $0x44] ss:$16 sps:$4 sm:$0xff]   ;;  %v2533_v22 = vld [vmem:[#allocation5 + $0x40] ss:$16 sps:$4 sm:$0xff]  }
  0x4b   :  { %1365 = vmatpush1.bf16.msra.mxu1 %v2516_v11  ;;  %1323 = vmatprep.subr.bf16.mxu0 %v2517_v12  ;;  %v2531_v21 = vld [vmem:[#allocation5 + $0x244] ss:$16 sps:$4 sm:$0xff]   ;;  %v2534_v23 = vld [vmem:[#allocation5 + $0x240] ss:$16 sps:$4 sm:$0xff]  }
  0x4c   :  { %1366 = vmatprep.subr.bf16.mxu1 %v2519_v13  ;;  %v2535_v24 = vld [vmem:[#allocation5 + $0x24] ss:$16 sps:$4 sm:$0xff]   ;;  %v2539_v26 = vld [vmem:[#allocation5 + $0x20] ss:$16 sps:$4 sm:$0xff]  }
  0x4d   :  { %v2537_v25 = vld [vmem:[#allocation5 + $0x224] ss:$16 sps:$4 sm:$0xff]   ;;  %v2540_v27 = vld [vmem:[#allocation5 + $0x220] ss:$16 sps:$4 sm:$0xff]  }
  0x4e   :  { %1324 = vmatpush1.bf16.msra.mxu0 %v2521_v14  ;;  %v2541_v28 = vld [vmem:[#allocation5 + $0x4] ss:$16 sps:$4 sm:$0xff]   ;;  %v2545_v30 = vld [vmem:[#allocation5] ss:$16 sps:$4 sm:$0xff]  }
  0x4f   :  { %1367 = vmatpush1.bf16.msra.mxu1 %v2522_v15  ;;  %1325 = vmatprep.subr.bf16.mxu0 %v2523_v16  ;;  %v2543_v29 = vld [vmem:[#allocation5 + $0x204] ss:$16 sps:$4 sm:$0xff]   ;;  %v2546_v31 = vld [vmem:[#allocation5 + $0x200] ss:$16 sps:$4 sm:$0xff]  }
  0x50   :  { %1368 = vmatprep.subr.bf16.mxu1 %v2525_v17  ;;  %v2547_v32 = vld [vmem:[#allocation5 + $0x1e4] ss:$16 sps:$4 sm:$0xff]   ;;  %v2551_v34 = vld [vmem:[#allocation5 + $0x1e0] ss:$16 sps:$4 sm:$0xff]   ;;  %v2606_v17 = vld [vmem:[#allocation5 + $0xec] ss:$16 sps:$4 sm:$0xff]  }
  0x51   :  { %v2549_v33 = vld [vmem:[#allocation5 + $0x3e4] ss:$16 sps:$4 sm:$0xff]   ;;  %v2552_v35 = vld [vmem:[#allocation5 + $0x3e0] ss:$16 sps:$4 sm:$0xff]  }
  0x52   :  { %1326 = vmatpush1.bf16.msra.mxu0 %v2527_v18  ;;  %v2553_v36 = vld [vmem:[#allocation5 + $0x1c4] ss:$16 sps:$4 sm:$0xff]   ;;  %v2557_v38 = vld [vmem:[#allocation5 + $0x1c0] ss:$16 sps:$4 sm:$0xff]  }
  0x53   :  { %1369 = vmatpush1.bf16.msra.mxu1 %v2528_v19  ;;  %1327 = vmatprep.subr.bf16.mxu0 %v2529_v20  ;;  %v2555_v37 = vld [vmem:[#allocation5 + $0x3c4] ss:$16 sps:$4 sm:$0xff]   ;;  %v2558_v39 = vld [vmem:[#allocation5 + $0x3c0] ss:$16 sps:$4 sm:$0xff]   ;;  %v107_v20 = vld [vmem:[#allocation2 + $0x68] sm:$0xff] }
  0x54   :  { %1370 = vmatprep.subr.bf16.mxu1 %v2531_v21  ;;  %v2559_v40 = vld [vmem:[#allocation5 + $0x1a4] ss:$16 sps:$4 sm:$0xff]   ;;  %v2563_v42 = vld [vmem:[#allocation5 + $0x1a0] ss:$16 sps:$4 sm:$0xff]   ;;  %v2972_v21 = vmov 0  }
  0x55   :  { %v2561_v41 = vld [vmem:[#allocation5 + $0x3a4] ss:$16 sps:$4 sm:$0xff]   ;;  %v2564_v43 = vld [vmem:[#allocation5 + $0x3a0] ss:$16 sps:$4 sm:$0xff]  }
  0x56   :  { %1328 = vmatpush1.bf16.msra.mxu0 %v2533_v22  ;;  %v2565_v44 = vld [vmem:[#allocation5 + $0x184] ss:$16 sps:$4 sm:$0xff]   ;;  %v2569_v50 = vld [vmem:[#allocation5 + $0x180] ss:$16 sps:$4 sm:$0xff]  }
  0x57   :  { %1371 = vmatpush1.bf16.msra.mxu1 %v2534_v23  ;;  %1329 = vmatprep.subr.bf16.mxu0 %v2535_v24  ;;  %v2567_v45 = vld [vmem:[#allocation5 + $0x384] ss:$16 sps:$4 sm:$0xff]   ;;  %v2570_v51 = vld [vmem:[#allocation5 + $0x380] ss:$16 sps:$4 sm:$0xff]   ;;  %v2604_v24 = vld [vmem:[#allocation5 + $0xe8] ss:$16 sps:$4 sm:$0xff]  }
  0x58   :  { %1372 = vmatprep.subr.bf16.mxu1 %v2537_v25  ;;  %v102_v47 = vld [vmem:[#allocation2 + $0x40] sm:$0xff]  ;;  %v104_v49 = vld [vmem:[#allocation2 + $0x50] sm:$0xff] }
  0x59   :  { %v2571_v52 = vld [vmem:[#allocation5 + $0x164] ss:$16 sps:$4 sm:$0xff]   ;;  %v3037_v53 = vpack.c.bf16 %v102_v47, %v95_v46  ;;  %v3039_v54 = vpack.c.bf16 %v104_v49, %v97_v48  ;;  %v2575_v56 = vld [vmem:[#allocation5 + $0x160] ss:$16 sps:$4 sm:$0xff]   ;;  %v2634_v47 = vld [vmem:[#allocation5 + $0x48] ss:$16 sps:$4 sm:$0xff]  }
  0x5a   :  { %1330 = vmatpush1.bf16.msra.mxu0 %v2539_v26  ;;  %v2573_v55 = vld [vmem:[#allocation5 + $0x364] ss:$16 sps:$4 sm:$0xff]   ;;  %v2576_v57 = vld [vmem:[#allocation5 + $0x360] ss:$16 sps:$4 sm:$0xff]   ;;  %v2612_v26 = vld [vmem:[#allocation5 + $0xcc] ss:$16 sps:$4 sm:$0xff]  }
  0x5b   :  { %1373 = vmatpush1.bf16.msra.mxu1 %v2540_v27  ;;  %1331 = vmatprep.subr.bf16.mxu0 %v2541_v28  ;;  %v2577_v58 = vld [vmem:[#allocation5 + $0x144] ss:$16 sps:$4 sm:$0xff]   ;;  %v2581_v60 = vld [vmem:[#allocation5 + $0x140] ss:$16 sps:$4 sm:$0xff]   ;;  %v2610_v28 = vld [vmem:[#allocation5 + $0xc8] ss:$16 sps:$4 sm:$0xff]  }
  0x5c   :  { %1374 = vmatprep.subr.bf16.mxu1 %v2543_v29  ;;  %1349 = vmatprep.mubr.bf16.mxu0 %v3037_v53  ;;  %v2579_v59 = vld [vmem:[#allocation5 + $0x344] ss:$16 sps:$4 sm:$0xff]   ;;  %v2582_v61 = vld [vmem:[#allocation5 + $0x340] ss:$16 sps:$4 sm:$0xff]   ;;  %v2642_v49 = vld [vmem:[#allocation5 + $0x2c] ss:$16 sps:$4 sm:$0xff]  }
  0x5d   :  { %1392 = vmatprep.mubr.bf16.mxu1 %v3039_v54  ;;  %v2583_v62 = vld [vmem:[#allocation5 + $0x124] ss:$16 sps:$4 sm:$0xff]   ;;  %v2587_v0 = vld [vmem:[#allocation5 + $0x120] ss:$16 sps:$4 sm:$0xff]  }
  0x5e   :  { %1332 = vmatpush1.bf16.msra.mxu0 %v2545_v30  ;;  %v2585_v63 = vld [vmem:[#allocation5 + $0x324] ss:$16 sps:$4 sm:$0xff]   ;;  %v2588_v1 = vld [vmem:[#allocation5 + $0x320] ss:$16 sps:$4 sm:$0xff]   ;;  %v2618_v30 = vld [vmem:[#allocation5 + $0xac] ss:$16 sps:$4 sm:$0xff]  }
  0x5f   :  { %1375 = vmatpush1.bf16.msra.mxu1 %v2546_v31  ;;  %1333 = vmatprep.subr.bf16.mxu0 %v2547_v32  ;;  %v2589_v2 = vld [vmem:[#allocation5 + $0x104] ss:$16 sps:$4 sm:$0xff]   ;;  %v2593_v4 = vld [vmem:[#allocation5 + $0x100] ss:$16 sps:$4 sm:$0xff]   ;;  %v2616_v32 = vld [vmem:[#allocation5 + $0xa8] ss:$16 sps:$4 sm:$0xff]  }
  0x60   :  { %1376 = vmatprep.subr.bf16.mxu1 %v2549_v33  ;;  %v2591_v3 = vld [vmem:[#allocation5 + $0x304] ss:$16 sps:$4 sm:$0xff]   ;;  %v2594_v5 = vld [vmem:[#allocation5 + $0x300] ss:$16 sps:$4 sm:$0xff]  }
  0x61   :  { %v94_v6 = vld [vmem:[#allocation2] sm:$0xff]  ;;  %v96_v8 = vld [vmem:[#allocation2 + $0x10] sm:$0xff] }
  0x62   :  { %1334 = vmatpush2.bf16.msra.mxu0 %v2551_v34  ;;  %v2597_v10 = vld [vmem:[#allocation5 + $0x4e4] ss:$16 sps:$4 sm:$0xff]   ;;  %v3043_v12 = vpack.c.bf16 %v101_v7, %v94_v6  ;;  %v3045_v13 = vpack.c.bf16 %v103_v9, %v96_v8  ;;  %v2595_v14 = vld [vmem:[#allocation5 + $0x4e0] ss:$16 sps:$4 sm:$0xff]   ;;  %v2624_v34 = vld [vmem:[#allocation5 + $0x8c] ss:$16 sps:$4 sm:$0xff]  }
  0x63   :  { %1377 = vmatpush2.bf16.msra.mxu1 %v2552_v35  ;;  %1335 = vmatprep.subr.bf16.mxu0 %v2553_v36  ;;  %v2600_v11 = vld [vmem:[#allocation5 + $0x604] ss:$16 sps:$4 sm:$0xff]   ;;  %v2598_v15 = vld [vmem:[#allocation5 + $0x600] ss:$16 sps:$4 sm:$0xff]   ;;  %v2622_v36 = vld [vmem:[#allocation5 + $0x88] ss:$16 sps:$4 sm:$0xff]  }
  0x64   :  { %1378 = vmatprep.subr.bf16.mxu1 %v2555_v37  ;;  %v2603_v16 = vld [vmem:[#allocation5 + $0x4c4] ss:$16 sps:$4 sm:$0xff]   ;;  %v2601_v18 = vld [vmem:[#allocation5 + $0x4c0] ss:$16 sps:$4 sm:$0xff]   ;;  %v2672_v6 = vld [vmem:[#allocation5 + $0x18c] ss:$16 sps:$4 sm:$0xff]  }
  0x65   :  { %v100_v19 = vld [vmem:[#allocation2 + $0x30] sm:$0xff]  ;;  %v2670_v8 = vld [vmem:[#allocation5 + $0x188] ss:$16 sps:$4 sm:$0xff]  }
  0x66   :  { %1336 = vmatpush2.bf16.msra.mxu0 %v2557_v38  ;;  %v2609_v22 = vld [vmem:[#allocation5 + $0x4a4] ss:$16 sps:$4 sm:$0xff]   ;;  %v3050_v23 = vpack.c.bf16 %v107_v20, %v100_v19  ;;  %v2607_v25 = vld [vmem:[#allocation5 + $0x4a0] ss:$16 sps:$4 sm:$0xff]   ;;  %v2630_v38 = vld [vmem:[#allocation5 + $0x6c] ss:$16 sps:$4 sm:$0xff]  }
  0x67   :  { %1379 = vmatpush2.bf16.msra.mxu1 %v2558_v39  ;;  %1337 = vmatprep.subr.bf16.mxu0 %v2559_v40  ;;  %v2615_v27 = vld [vmem:[#allocation5 + $0x484] ss:$16 sps:$4 sm:$0xff]   ;;  %v2613_v29 = vld [vmem:[#allocation5 + $0x480] ss:$16 sps:$4 sm:$0xff]   ;;  %v2628_v40 = vld [vmem:[#allocation5 + $0x68] ss:$16 sps:$4 sm:$0xff]  }
  0x68   :  { %1380 = vmatprep.subr.bf16.mxu1 %v2561_v41  ;;  %v2621_v31 = vld [vmem:[#allocation5 + $0x464] ss:$16 sps:$4 sm:$0xff]   ;;  %v2619_v33 = vld [vmem:[#allocation5 + $0x460] ss:$16 sps:$4 sm:$0xff]   ;;  %v99_v41 = vld [vmem:[#allocation2 + $0x28] sm:$0xff] }
  0x69   :  { %v2627_v35 = vld [vmem:[#allocation5 + $0x444] ss:$16 sps:$4 sm:$0xff]   ;;  %v2625_v37 = vld [vmem:[#allocation5 + $0x440] ss:$16 sps:$4 sm:$0xff]  }
  0x6a   :  { %1338 = vmatpush2.bf16.msra.mxu0 %v2563_v42  ;;  %v2633_v39 = vld [vmem:[#allocation5 + $0x424] ss:$16 sps:$4 sm:$0xff]   ;;  %v2637_v48 = vld [vmem:[#allocation5 + $0x400] ss:$16 sps:$4 sm:$0xff]  }
  0x6b   :  { %1381 = vmatpush2.bf16.msra.mxu1 %v2564_v43  ;;  %1339 = vmatprep.subr.bf16.mxu0 %v2565_v44  ;;  %v106_v42 = vld [vmem:[#allocation2 + $0x60] sm:$0xff] }
  0x6c   :  { %1382 = vmatprep.subr.bf16.mxu1 %v2567_v45  ;;  %v2631_v43 = vld [vmem:[#allocation5 + $0x420] ss:$16 sps:$4 sm:$0xff]   ;;  %v3055_v44 = vpack.c.bf16 %v106_v42, %v99_v41  ;;  %v2636_v45 = vld [vmem:[#allocation5 + $0x4c] ss:$16 sps:$4 sm:$0xff]   ;;  %v2639_v46 = vld [vmem:[#allocation5 + $0x404] ss:$16 sps:$4 sm:$0xff]  }
  0x6d   :  { %v2675_v7 = vld [vmem:[#allocation5 + $0x544] ss:$16 sps:$4 sm:$0xff]   ;;  %v2673_v9 = vld [vmem:[#allocation5 + $0x540] ss:$16 sps:$4 sm:$0xff]   ;;  %v2714_v41 = vld [vmem:[#allocation5 + $0x4ac] ss:$16 sps:$4 sm:$0xff]  }
  0x6e   :  { %1340 = vmatpush2.bf16.msra.mxu0 %v2569_v50  ;;  %v2645_v50 = vld [vmem:[#allocation5 + $0x5e4] ss:$16 sps:$4 sm:$0xff]   ;;  %v2685_v19 = vld [vmem:[#allocation5 + $0x500] ss:$16 sps:$4 sm:$0xff]   ;;  %v2717_v42 = vld [vmem:[#allocation5 + $0x26c] ss:$16 sps:$4 sm:$0xff]  }
  0x6f   :  { %1383 = vmatpush2.bf16.msra.mxu1 %v2570_v51  ;;  %1341 = vmatprep.subr.bf16.mxu0 %v2571_v52  ;;  %v2640_v51 = vld [vmem:[#allocation5 + $0x28] ss:$16 sps:$4 sm:$0xff]   ;;  %v2643_v52 = vld [vmem:[#allocation5 + $0x5e0] ss:$16 sps:$4 sm:$0xff]  }
  0x70   :  { %1384 = vmatprep.subr.bf16.mxu1 %v2573_v55  ;;  %v2651_v55 = vld [vmem:[#allocation5 + $0x5c4] ss:$16 sps:$4 sm:$0xff]  }
  0x71   :  { %v98_v20 = vld [vmem:[#allocation2 + $0x20] sm:$0xff] }
  0x72   :  { %1342 = vmatpush2.bf16.msra.mxu0 %v2575_v56  ;;  %v2646_v56 = vld [vmem:[#allocation5 + $0x8] ss:$16 sps:$4 sm:$0xff]  }
  0x73   :  { %1385 = vmatpush2.bf16.msra.mxu1 %v2576_v57  ;;  %1343 = vmatprep.subr.bf16.mxu0 %v2577_v58  ;;  %v2649_v57 = vld [vmem:[#allocation5 + $0x5c0] ss:$16 sps:$4 sm:$0xff]   ;;  %v2654_v58 = vld [vmem:[#allocation5 + $0x1ec] ss:$16 sps:$4 sm:$0xff]  }
  0x74   :  { %1386 = vmatprep.subr.bf16.mxu1 %v2579_v59  ;;  %v2657_v59 = vld [vmem:[#allocation5 + $0x5a4] ss:$16 sps:$4 sm:$0xff]  }
  0x76   :  { %1344 = vmatpush2.bf16.msra.mxu0 %v2581_v60  ;;  %v2652_v60 = vld [vmem:[#allocation5 + $0x1e8] ss:$16 sps:$4 sm:$0xff]  }
  0x77   :  { %1387 = vmatpush2.bf16.msra.mxu1 %v2582_v61  ;;  %1345 = vmatprep.subr.bf16.mxu0 %v2583_v62  ;;  %v2655_v61 = vld [vmem:[#allocation5 + $0x5a0] ss:$16 sps:$4 sm:$0xff]   ;;  %v2660_v62 = vld [vmem:[#allocation5 + $0x1cc] ss:$16 sps:$4 sm:$0xff]  }
  0x78   :  { %1388 = vmatprep.subr.bf16.mxu1 %v2585_v63  ;;  %v2663_v63 = vld [vmem:[#allocation5 + $0x584] ss:$16 sps:$4 sm:$0xff]  }
  0x7a   :  { %1346 = vmatpush2.bf16.msra.mxu0 %v2587_v0  ;;  %v2658_v0 = vld [vmem:[#allocation5 + $0x1c8] ss:$16 sps:$4 sm:$0xff]  }
  0x7b   :  { %1389 = vmatpush2.bf16.msra.mxu1 %v2588_v1  ;;  %1347 = vmatprep.subr.bf16.mxu0 %v2589_v2  ;;  %v2661_v1 = vld [vmem:[#allocation5 + $0x580] ss:$16 sps:$4 sm:$0xff]   ;;  %v2666_v2 = vld [vmem:[#allocation5 + $0x1ac] ss:$16 sps:$4 sm:$0xff]  }
  0x7c   :  { %1390 = vmatprep.subr.bf16.mxu1 %v2591_v3  ;;  %v2669_v3 = vld [vmem:[#allocation5 + $0x564] ss:$16 sps:$4 sm:$0xff]  }
  0x7e   :  { %1348 = vmatpush2.bf16.msra.mxu0 %v2593_v4  ;;  %v2664_v4 = vld [vmem:[#allocation5 + $0x1a8] ss:$16 sps:$4 sm:$0xff]  }
  0x7f   :  { %1391 = vmatpush2.bf16.msra.mxu1 %v2594_v5  ;;  %1403 = vmatprep.subr.bf16.mxu0 %v2597_v10  ;;  %v2667_v5 = vld [vmem:[#allocation5 + $0x560] ss:$16 sps:$4 sm:$0xff]   ;;  %v2678_v10 = vld [vmem:[#allocation5 + $0x16c] ss:$16 sps:$4 sm:$0xff]  }
  0x80   :  { %1460 = vmatprep.subr.bf16.mxu1 %v2600_v11  ;;  %v2681_v11 = vld [vmem:[#allocation5 + $0x524] ss:$16 sps:$4 sm:$0xff]  }
  0x81   :  { %1350 = vmatmul.mubr.bf16.vlgmr.msra.gmra.mxu0 %v3043_v12 }
  0x82   :  { %1393 = vmatmul.mubr.bf16.vlgmr.msra.gmra.mxu1 %v3045_v13  ;;  %1404 = vmatpush1.bf16.msra.mxu0 %v2595_v14  ;;  %v2676_v14 = vld [vmem:[#allocation5 + $0x168] ss:$16 sps:$4 sm:$0xff]  }
  0x83   :  { %1461 = vmatpush1.bf16.msra.mxu1 %v2598_v15  ;;  %1405 = vmatprep.subr.bf16.mxu0 %v2603_v16  ;;  %v2679_v15 = vld [vmem:[#allocation5 + $0x520] ss:$16 sps:$4 sm:$0xff]   ;;  %v2684_v16 = vld [vmem:[#allocation5 + $0x14c] ss:$16 sps:$4 sm:$0xff]  }
  0x84   :  { %1478 = vmatprep.mubr.bf16.mxu1 %v2972_v21  ;;  %1489 = vmatprep.subr.bf16.mxu1 %v2606_v17  ;;  %v2687_v17 = vld [vmem:[#allocation5 + $0x504] ss:$16 sps:$4 sm:$0xff]  }
  0x85   :  { %1435 = vmatprep.mubr.bf16.mxu0 %v3055_v44 }
  0x86   :  { %1406 = vmatpush1.bf16.msra.mxu0 %v2601_v18  ;;  %v2682_v18 = vld [vmem:[#allocation5 + $0x148] ss:$16 sps:$4 sm:$0xff]  }
  0x87   :  { %1407 = vmatprep.subr.bf16.mxu0 %v2609_v22  ;;  %v105_v22 = vld [vmem:[#allocation2 + $0x58] sm:$0xff] }
  0x8a   :  { %2358 = vmatmul.mubr.msk.bf16.vlgmr.msra.gmra.mxu1 %vm1313_vm0, %v3050_v23  ;;  %1408 = vmatpush1.bf16.msra.mxu0 %v2607_v25  ;;  %v2693_v25 = vld [vmem:[#allocation5 + $0x2ec] ss:$16 sps:$4 sm:$0xff]  }
  0x8b   :  { %1490 = vmatpush1.bf16.msra.mxu1 %v2604_v24  ;;  %1409 = vmatprep.subr.bf16.mxu0 %v2615_v27  ;;  %v2690_v24 = vld [vmem:[#allocation5 + $0x12c] ss:$16 sps:$4 sm:$0xff]   ;;  %v2688_v27 = vld [vmem:[#allocation5 + $0x128] ss:$16 sps:$4 sm:$0xff]  }
  0x8c   :  { %1491 = vmatprep.subr.bf16.mxu1 %v2612_v26  ;;  %1521 = vmatprep.mubr.bf16.mxu1 %v3037_v53  ;;  %v2648_v53 = vld [vmem:[#allocation5 + $0xc] ss:$16 sps:$4 sm:$0xff]   ;;  %v3058_v26 = vpack.c.bf16 %v105_v22, %v98_v20  ;;  %v2772_v20 = vld [vmem:[#allocation5 + $0x568] ss:$16 sps:$4 sm:$0xff]  }
  0x8d   :  { %v2775_v22 = vld [vmem:[#allocation5 + $0x328] ss:$16 sps:$4 sm:$0xff]  }
  0x8e   :  { %1410 = vmatpush1.bf16.msra.mxu0 %v2613_v29  ;;  %v2696_v29 = vld [vmem:[#allocation5 + $0x10c] ss:$16 sps:$4 sm:$0xff]  }
  0x8f   :  { %1492 = vmatpush1.bf16.msra.mxu1 %v2610_v28  ;;  %1411 = vmatprep.subr.bf16.mxu0 %v2621_v31  ;;  %v2691_v28 = vld [vmem:[#allocation5 + $0x2e8] ss:$16 sps:$4 sm:$0xff]  }
  0x90   :  { %1493 = vmatprep.subr.bf16.mxu1 %v2618_v30  ;;  %v2699_v30 = vld [vmem:[#allocation5 + $0x2cc] ss:$16 sps:$4 sm:$0xff]   ;;  %v2694_v31 = vld [vmem:[#allocation5 + $0x108] ss:$16 sps:$4 sm:$0xff]  }
  0x92   :  { %1412 = vmatpush1.bf16.msra.mxu0 %v2619_v33  ;;  %v2702_v33 = vld [vmem:[#allocation5 + $0x4ec] ss:$16 sps:$4 sm:$0xff]  }
  0x93   :  { %1494 = vmatpush1.bf16.msra.mxu1 %v2616_v32  ;;  %1413 = vmatprep.subr.bf16.mxu0 %v2627_v35  ;;  %v2697_v32 = vld [vmem:[#allocation5 + $0x2c8] ss:$16 sps:$4 sm:$0xff]  }
  0x94   :  { %1495 = vmatprep.subr.bf16.mxu1 %v2624_v34  ;;  %v2705_v34 = vld [vmem:[#allocation5 + $0x2ac] ss:$16 sps:$4 sm:$0xff]   ;;  %v2700_v35 = vld [vmem:[#allocation5 + $0x4e8] ss:$16 sps:$4 sm:$0xff]  }
  0x96   :  { %1414 = vmatpush1.bf16.msra.mxu0 %v2625_v37  ;;  %v2708_v37 = vld [vmem:[#allocation5 + $0x4cc] ss:$16 sps:$4 sm:$0xff]  }
  0x97   :  { %1496 = vmatpush1.bf16.msra.mxu1 %v2622_v36  ;;  %1415 = vmatprep.subr.bf16.mxu0 %v2633_v39  ;;  %v2703_v36 = vld [vmem:[#allocation5 + $0x2a8] ss:$16 sps:$4 sm:$0xff]  }
  0x98   :  { %1497 = vmatprep.subr.bf16.mxu1 %v2630_v38  ;;  %v2711_v38 = vld [vmem:[#allocation5 + $0x28c] ss:$16 sps:$4 sm:$0xff]   ;;  %v2706_v39 = vld [vmem:[#allocation5 + $0x4c8] ss:$16 sps:$4 sm:$0xff]  }
  0x9a   :  { %1416 = vmatpush1.bf16.msra.mxu0 %v2631_v43  ;;  %v2712_v43 = vld [vmem:[#allocation5 + $0x4a8] ss:$16 sps:$4 sm:$0xff]  }
  0x9b   :  { %1498 = vmatpush1.bf16.msra.mxu1 %v2628_v40  ;;  %1417 = vmatprep.subr.bf16.mxu0 %v2639_v46  ;;  %v2709_v40 = vld [vmem:[#allocation5 + $0x288] ss:$16 sps:$4 sm:$0xff]   ;;  %v2723_v46 = vld [vmem:[#allocation5 + $0x24c] ss:$16 sps:$4 sm:$0xff]  }
  0x9c   :  { %1499 = vmatprep.subr.bf16.mxu1 %v2636_v45  ;;  %v2715_v45 = vld [vmem:[#allocation5 + $0x268] ss:$16 sps:$4 sm:$0xff]  }
  0x9e   :  { %1418 = vmatpush1.bf16.msra.mxu0 %v2637_v48  ;;  %v2721_v48 = vld [vmem:[#allocation5 + $0x248] ss:$16 sps:$4 sm:$0xff]  }
  0x9f   :  { %1500 = vmatpush1.bf16.msra.mxu1 %v2634_v47  ;;  %1419 = vmatprep.subr.bf16.mxu0 %v2645_v50  ;;  %v2718_v47 = vld [vmem:[#allocation5 + $0x488] ss:$16 sps:$4 sm:$0xff]  }
  0xa0   :  { %1501 = vmatprep.subr.bf16.mxu1 %v2642_v49  ;;  %v2726_v49 = vld [vmem:[#allocation5 + $0x46c] ss:$16 sps:$4 sm:$0xff]   ;;  %v2724_v50 = vld [vmem:[#allocation5 + $0x468] ss:$16 sps:$4 sm:$0xff]  }
  0xa2   :  { %1420 = vmatpush2.bf16.msra.mxu0 %v2643_v52  ;;  %v2732_v52 = vld [vmem:[#allocation5 + $0x44c] ss:$16 sps:$4 sm:$0xff]  }
  0xa3   :  { %1502 = vmatpush1.bf16.msra.mxu1 %v2640_v51  ;;  %1421 = vmatprep.subr.bf16.mxu0 %v2651_v55  ;;  %v2727_v51 = vld [vmem:[#allocation5 + $0x228] ss:$16 sps:$4 sm:$0xff]  }
  0xa4   :  { %1503 = vmatprep.subr.bf16.mxu1 %v2648_v53  ;;  %v2735_v53 = vld [vmem:[#allocation5 + $0x20c] ss:$16 sps:$4 sm:$0xff]   ;;  %v2733_v55 = vld [vmem:[#allocation5 + $0x208] ss:$16 sps:$4 sm:$0xff]  }
  0xa6   :  { %1422 = vmatpush2.bf16.msra.mxu0 %v2649_v57  ;;  %v2741_v57 = vld [vmem:[#allocation5 + $0x3ec] ss:$16 sps:$4 sm:$0xff]  }
  0xa7   :  { %1504 = vmatpush1.bf16.msra.mxu1 %v2646_v56  ;;  %1423 = vmatprep.subr.bf16.mxu0 %v2657_v59  ;;  %v2738_v56 = vld [vmem:[#allocation5 + $0x42c] ss:$16 sps:$4 sm:$0xff]   ;;  %v2739_v59 = vld [vmem:[#allocation5 + $0x3e8] ss:$16 sps:$4 sm:$0xff]  }
  0xa8   :  { %1505 = vmatprep.subr.bf16.mxu1 %v2654_v58  ;;  %v2736_v58 = vld [vmem:[#allocation5 + $0x428] ss:$16 sps:$4 sm:$0xff]  }
  0xaa   :  { %1424 = vmatpush2.bf16.msra.mxu0 %v2655_v61  ;;  %v2747_v61 = vld [vmem:[#allocation5 + $0x3cc] ss:$16 sps:$4 sm:$0xff]  }
  0xab   :  { %1506 = vmatpush2.bf16.msra.mxu1 %v2652_v60  ;;  %1425 = vmatprep.subr.bf16.mxu0 %v2663_v63  ;;  %v2744_v60 = vld [vmem:[#allocation5 + $0x40c] ss:$16 sps:$4 sm:$0xff]   ;;  %v2745_v63 = vld [vmem:[#allocation5 + $0x3c8] ss:$16 sps:$4 sm:$0xff]  }
  0xac   :  { %1507 = vmatprep.subr.bf16.mxu1 %v2660_v62  ;;  %v2742_v62 = vld [vmem:[#allocation5 + $0x408] ss:$16 sps:$4 sm:$0xff]  }
  0xae   :  { %1426 = vmatpush2.bf16.msra.mxu0 %v2661_v1  ;;  %v2753_v1 = vld [vmem:[#allocation5 + $0x3ac] ss:$16 sps:$4 sm:$0xff]  }
  0xaf   :  { %1508 = vmatpush2.bf16.msra.mxu1 %v2658_v0  ;;  %1427 = vmatprep.subr.bf16.mxu0 %v2669_v3  ;;  %v2750_v0 = vld [vmem:[#allocation5 + $0x5ec] ss:$16 sps:$4 sm:$0xff]   ;;  %v2751_v3 = vld [vmem:[#allocation5 + $0x3a8] ss:$16 sps:$4 sm:$0xff]  }
  0xb0   :  { %1509 = vmatprep.subr.bf16.mxu1 %v2666_v2  ;;  %v2748_v2 = vld [vmem:[#allocation5 + $0x5e8] ss:$16 sps:$4 sm:$0xff]  }
  0xb2   :  { %1428 = vmatpush2.bf16.msra.mxu0 %v2667_v5  ;;  %v2759_v5 = vld [vmem:[#allocation5 + $0x38c] ss:$16 sps:$4 sm:$0xff]  }
  0xb3   :  { %1510 = vmatpush2.bf16.msra.mxu1 %v2664_v4  ;;  %1429 = vmatprep.subr.bf16.mxu0 %v2675_v7  ;;  %v2756_v4 = vld [vmem:[#allocation5 + $0x5cc] ss:$16 sps:$4 sm:$0xff]   ;;  %v2757_v7 = vld [vmem:[#allocation5 + $0x388] ss:$16 sps:$4 sm:$0xff]  }
  0xb4   :  { %1511 = vmatprep.subr.bf16.mxu1 %v2672_v6  ;;  %v2754_v6 = vld [vmem:[#allocation5 + $0x5c8] ss:$16 sps:$4 sm:$0xff]  }
  0xb6   :  { %1430 = vmatpush2.bf16.msra.mxu0 %v2673_v9  ;;  %v2765_v9 = vld [vmem:[#allocation5 + $0x36c] ss:$16 sps:$4 sm:$0xff]  }
  0xb7   :  { %1512 = vmatpush2.bf16.msra.mxu1 %v2670_v8  ;;  %1431 = vmatprep.subr.bf16.mxu0 %v2681_v11  ;;  %v2762_v8 = vld [vmem:[#allocation5 + $0x5ac] ss:$16 sps:$4 sm:$0xff]   ;;  %v2763_v11 = vld [vmem:[#allocation5 + $0x368] ss:$16 sps:$4 sm:$0xff]  }
  0xb8   :  { %1513 = vmatprep.subr.bf16.mxu1 %v2678_v10  ;;  %v2760_v10 = vld [vmem:[#allocation5 + $0x5a8] ss:$16 sps:$4 sm:$0xff]  }
  0xba   :  { %1432 = vmatpush2.bf16.msra.mxu0 %v2679_v15  ;;  %v2771_v15 = vld [vmem:[#allocation5 + $0x34c] ss:$16 sps:$4 sm:$0xff]  }
  0xbb   :  { %1514 = vmatpush2.bf16.msra.mxu1 %v2676_v14  ;;  %1433 = vmatprep.subr.bf16.mxu0 %v2687_v17  ;;  %v2768_v14 = vld [vmem:[#allocation5 + $0x58c] ss:$16 sps:$4 sm:$0xff]   ;;  %v2769_v17 = vld [vmem:[#allocation5 + $0x348] ss:$16 sps:$4 sm:$0xff]  }
  0xbc   :  { %1515 = vmatprep.subr.bf16.mxu1 %v2684_v16  ;;  %v2766_v16 = vld [vmem:[#allocation5 + $0x588] ss:$16 sps:$4 sm:$0xff]  }
  0xbe   :  { %1434 = vmatpush2.bf16.msra.mxu0 %v2685_v19  ;;  %v2777_v19 = vld [vmem:[#allocation5 + $0x32c] ss:$16 sps:$4 sm:$0xff]  }
  0xbf   :  { %1516 = vmatpush2.bf16.msra.mxu1 %v2682_v18  ;;  %1532 = vmatprep.subr.bf16.mxu0 %v2693_v25  ;;  %v2774_v18 = vld [vmem:[#allocation5 + $0x56c] ss:$16 sps:$4 sm:$0xff]  }
  0xc0   :  { %1517 = vmatprep.subr.bf16.mxu1 %v2690_v24  ;;  %v2780_v24 = vld [vmem:[#allocation5 + $0x54c] ss:$16 sps:$4 sm:$0xff]  }
  0xc1   :  { %1436 = vmatmul.mubr.bf16.vlgmr.msra.gmra.mxu0 %v3058_v26  ;;  %v2783_v25 = vld [vmem:[#allocation5 + $0x30c] ss:$16 sps:$4 sm:$0xff]  }
  0xc2   :  { %1533 = vmatpush1.bf16.msra.mxu0 %v2691_v28  ;;  %1564 = vmatprep.mubr.bf16.mxu0 %v3039_v54  ;;  %v2720_v54 = vld [vmem:[#allocation5 + $0x48c] ss:$16 sps:$4 sm:$0xff]   ;;  %v2781_v28 = vld [vmem:[#allocation5 + $0x308] ss:$16 sps:$4 sm:$0xff]  }
  0xc3   :  { %1518 = vmatpush2.bf16.msra.mxu1 %v2688_v27  ;;  %1534 = vmatprep.subr.bf16.mxu0 %v2699_v30  ;;  %v2778_v27 = vld [vmem:[#allocation5 + $0x548] ss:$16 sps:$4 sm:$0xff]   ;;  %v2793_v30 = vld [vmem:[#allocation8 + $0x78] sm:$0xff]  }
  0xc4   :  { %1519 = vmatprep.subr.bf16.mxu1 %v2696_v29  ;;  %v2786_v29 = vld [vmem:[#allocation5 + $0x52c] ss:$16 sps:$4 sm:$0xff]  }
  0xc6   :  { %1535 = vmatpush1.bf16.msra.mxu0 %v2697_v32  ;;  %v2794_v32 = vld [vmem:[#allocation8 + $0x38] sm:$0xff]  }
  0xc7   :  { %1520 = vmatpush2.bf16.msra.mxu1 %v2694_v31  ;;  %1536 = vmatprep.subr.bf16.mxu0 %v2705_v34  ;;  %v2784_v31 = vld [vmem:[#allocation5 + $0x528] ss:$16 sps:$4 sm:$0xff]  }
  0xc8   :  { %1575 = vmatprep.subr.bf16.mxu1 %v2702_v33  ;;  %v2789_v33 = vld [vmem:[#allocation5 + $0x50c] ss:$16 sps:$4 sm:$0xff]   ;;  %v2795_v34 = vld [vmem:[#allocation8 + $0x70] sm:$0xff]  }
  0xca   :  { %1522 = vmatmul.mubr.bf16.vlgmr.msra.gmra.mxu1 %v3043_v12  ;;  %1537 = vmatpush1.bf16.msra.mxu0 %v2703_v36  ;;  %v2729_v12 = vld [vmem:[#allocation5 + $0x22c] ss:$16 sps:$4 sm:$0xff]   ;;  %v2796_v36 = vld [vmem:[#allocation8 + $0x30] sm:$0xff]  }
  0xcb   :  { %1576 = vmatpush1.bf16.msra.mxu1 %v2700_v35  ;;  %1538 = vmatprep.subr.bf16.mxu0 %v2711_v38  ;;  %v2787_v35 = vld [vmem:[#allocation5 + $0x508] ss:$16 sps:$4 sm:$0xff]   ;;  %v2797_v38 = vld [vmem:[#allocation8 + $0x68] sm:$0xff]  }
  0xcc   :  { %1577 = vmatprep.subr.bf16.mxu1 %v2708_v37  ;;  %1607 = vmatprep.mubr.bf16.mxu1 %v3055_v44  ;;  %v2730_v44 = vld [vmem:[#allocation5 + $0x448] ss:$16 sps:$4 sm:$0xff]   ;;  %v2792_v37 = vld [vmem:[#allocation5 + $0x60c] ss:$16 sps:$4 sm:$0xff]  }
  0xce   :  { %1539 = vmatpush1.bf16.msra.mxu0 %v2709_v40  ;;  %v2798_v40 = vld [vmem:[#allocation8 + $0x28] sm:$0xff]  }
  0xcf   :  { %1578 = vmatpush1.bf16.msra.mxu1 %v2706_v39  ;;  %1540 = vmatprep.subr.bf16.mxu0 %v2717_v42  ;;  %v2790_v39 = vld [vmem:[#allocation5 + $0x608] ss:$16 sps:$4 sm:$0xff]   ;;  %v2801_v42 = vld [vmem:[#allocation8 + $0x58] sm:$0xff]  }
  0xd0   :  { %1579 = vmatprep.subr.bf16.mxu1 %v2714_v41  ;;  %v2799_v41 = vld [vmem:[#allocation8 + $0x60] sm:$0xff]  }
  0xd2   :  { %1541 = vmatpush1.bf16.msra.mxu0 %v2715_v45  ;;  %v2803_v45 = vld [vmem:[#allocation8 + $0x50] sm:$0xff]  }
  0xd3   :  { %1580 = vmatpush1.bf16.msra.mxu1 %v2712_v43  ;;  %1542 = vmatprep.subr.bf16.mxu0 %v2723_v46  ;;  %v2802_v43 = vld [vmem:[#allocation8 + $0x18] sm:$0xff]  }
  0xd4   :  { %1581 = vmatprep.subr.bf16.mxu1 %v2720_v54  ;;  %v2809_v54 = vld [vmem:[#allocation8 + $0xf8] sm:$0xff]  }
  0xd5   :  { %v2810_v46 = vld [vmem:[#allocation8 + $0xb8] sm:$0xff]  }
  0xd6   :  { %1543 = vmatpush1.bf16.msra.mxu0 %v2721_v48  ;;  %v2807_v48 = vld [vmem:[#allocation8 + $0x40] sm:$0xff]  }
  0xd7   :  { %1582 = vmatpush1.bf16.msra.mxu1 %v2718_v47  ;;  %1544 = vmatprep.subr.bf16.mxu0 %v2729_v12  ;;  %v2804_v47 = vld [vmem:[#allocation8 + $0x10] sm:$0xff]  }
  0xd8   :  { %1583 = vmatprep.subr.bf16.mxu1 %v2726_v49  ;;  %v2808_v49 = vld [vmem:[#allocation8] sm:$0xff]   ;;  %v2811_v12 = vld [vmem:[#allocation8 + $0xf0] sm:$0xff]  }
  0xda   :  { %1545 = vmatpush1.bf16.msra.mxu0 %v2727_v51  ;;  %v2814_v51 = vld [vmem:[#allocation8 + $0xa8] sm:$0xff]  }
  0xdb   :  { %1584 = vmatpush1.bf16.msra.mxu1 %v2724_v50  ;;  %1546 = vmatprep.subr.bf16.mxu0 %v2735_v53  ;;  %v2812_v50 = vld [vmem:[#allocation8 + $0xb0] sm:$0xff]   ;;  %v2816_v53 = vld [vmem:[#allocation8 + $0xa0] sm:$0xff]  }
  0xdc   :  { %1585 = vmatprep.subr.bf16.mxu1 %v2732_v52  ;;  %v2815_v52 = vld [vmem:[#allocation8 + $0xe0] sm:$0xff]  }
  0xde   :  { %1547 = vmatpush1.bf16.msra.mxu0 %v2733_v55  ;;  %v2818_v55 = vld [vmem:[#allocation8 + $0x98] sm:$0xff]  }
  0xdf   :  { %1586 = vmatpush1.bf16.msra.mxu1 %v2730_v44  ;;  %1548 = vmatprep.subr.bf16.mxu0 %v2741_v57  ;;  %v2817_v44 = vld [vmem:[#allocation8 + $0xd8] sm:$0xff]   ;;  %v2820_v57 = vld [vmem:[#allocation8 + $0x90] sm:$0xff]  }
  0xe0   :  { %1587 = vmatprep.subr.bf16.mxu1 %v2738_v56  ;;  %v2819_v56 = vld [vmem:[#allocation8 + $0xd0] sm:$0xff]  }
  0xe2   :  { %1549 = vmatpush2.bf16.msra.mxu0 %v2739_v59  ;;  %v2822_v59 = vld [vmem:[#allocation8 + $0x88] sm:$0xff]  }
  0xe3   :  { %1588 = vmatpush1.bf16.msra.mxu1 %v2736_v58  ;;  %1550 = vmatprep.subr.bf16.mxu0 %v2747_v61  ;;  %v2821_v58 = vld [vmem:[#allocation8 + $0xc8] sm:$0xff]   ;;  %v2824_v61 = vld [vmem:[#allocation8 + $0x80] sm:$0xff]  }
  0xe4   :  { %1589 = vmatprep.subr.bf16.mxu1 %v2744_v60  ;;  %v2823_v60 = vld [vmem:[#allocation8 + $0xc0] sm:$0xff]  }
  0xe6   :  { %1551 = vmatpush2.bf16.msra.mxu0 %v2745_v63  ;;  %v313_v63 = vlaneseq }
  0xe7   :  { %1590 = vmatpush1.bf16.msra.mxu1 %v2742_v62  ;;  %1552 = vmatprep.subr.bf16.mxu0 %v2753_v1 }
  0xe8   :  { %1591 = vmatprep.subr.bf16.mxu1 %v2750_v0  ;;  %v314_v1 = vshrl.u32 %v313_v63, 7 }
  0xea   :  { %1553 = vmatpush2.bf16.msra.mxu0 %v2751_v3 }
  0xeb   :  { %1592 = vmatpush2.bf16.msra.mxu1 %v2748_v2  ;;  %1554 = vmatprep.subr.bf16.mxu0 %v2759_v5  ;;  %v315_v5 = vsub.s32 0, %v314_v1 }
  0xec   :  { %1593 = vmatprep.subr.bf16.mxu1 %v2756_v4  ;;  %v319_v4 = vsub.s32 1, %v314_v1 }
  0xee   :  { %1555 = vmatpush2.bf16.msra.mxu0 %v2757_v7  ;;  %v311_v7 = vld [vmem:[#allocation7] sm:$0xf] }
  0xef   :  { %1594 = vmatpush2.bf16.msra.mxu1 %v2754_v6  ;;  %1556 = vmatprep.subr.bf16.mxu0 %v2765_v9  ;;  %v320_v9 = vrot.slane %v311_v7, %v319_v4 }
  0xf0   :  { %1595 = vmatprep.subr.bf16.mxu1 %v2762_v8 }
  0xf2   :  { %1557 = vmatpush2.bf16.msra.mxu0 %v2763_v11 }
  0xf3   :  { %1596 = vmatpush2.bf16.msra.mxu1 %v2760_v10  ;;  %1558 = vmatprep.subr.bf16.mxu0 %v2771_v15  ;;  %v316_v10 = vrot.slane %v311_v7, %v315_v5 }
  0xf4   :  { %1597 = vmatprep.subr.bf16.mxu1 %v2768_v14 }
  0xf6   :  { %1559 = vmatpush2.bf16.msra.mxu0 %v2769_v17 }
  0xf7   :  { %1598 = vmatpush2.bf16.msra.mxu1 %v2766_v16  ;;  %1560 = vmatprep.subr.bf16.mxu0 %v2777_v19 }
  0xf8   :  { %1599 = vmatprep.subr.bf16.mxu1 %v2774_v18 }
  0xfa   :  { %1561 = vmatpush2.bf16.msra.mxu0 %v2775_v22 }
  0xfb   :  { %1600 = vmatpush2.bf16.msra.mxu1 %v2772_v20  ;;  %1562 = vmatprep.subr.bf16.mxu0 %v2783_v25 }
  0xfc   :  { %1601 = vmatprep.subr.bf16.mxu1 %v2780_v24 }
  0xfe   :  { %1563 = vmatpush2.bf16.msra.mxu0 %v2781_v28 }
  0xff   :  { %1602 = vmatpush2.bf16.msra.mxu1 %v2778_v27  ;;  %2411 = vmatprep.subr.bf16.mxu0 %v2793_v30 }
 0x100   :  { %1603 = vmatprep.subr.bf16.mxu1 %v2786_v29 }
 0x101   :  { %1565 = vmatmul.mubr.bf16.vlgmr.msra.gmra.mxu0 %v3045_v13  ;;  %v2800_v13 = vld [vmem:[#allocation8 + $0x20] sm:$0xff]  }
 0x102   :  { %2412 = vmatpush3.bf16.msra.mxu0 %v2794_v32 }
 0x103   :  { %1604 = vmatpush2.bf16.msra.mxu1 %v2784_v31  ;;  %2413 = vmatprep.subr.bf16.mxu0 %v2795_v34 }
 0x104   :  { %1605 = vmatprep.subr.bf16.mxu1 %v2789_v33 }
 0x106   :  { %2414 = vmatpush3.bf16.msra.mxu0 %v2796_v36 }
 0x107   :  { %1606 = vmatpush2.bf16.msra.mxu1 %v2787_v35  ;;  %2415 = vmatprep.subr.bf16.mxu0 %v2797_v38 }
 0x108   :  { %1632 = vmatprep.subr.bf16.mxu1 %v2792_v37 }
 0x10a   :  { %1608 = vmatmul.mubr.bf16.vlgmr.msra.gmra.mxu1 %v3058_v26  ;;  %2416 = vmatpush3.bf16.msra.mxu0 %v2798_v40  ;;  %v2805_v26 = vld [vmem:[#allocation8 + $0x48] sm:$0xff]  }
 0x10b   :  { %1633 = vmatpush1.bf16.msra.mxu1 %v2790_v39  ;;  %1650 = vmatprep.mubr.bf16.mxu1 %v2972_v21  ;;  %v2806_v21 = vld [vmem:[#allocation8 + $0x8] sm:$0xff]  }
 0x10c   :  { %2417 = vmatprep.subr.bf16.mxu0 %v2799_v41  ;;  %2433 = vmatprep.subr.bf16.mxu1 %v2809_v54 }
 0x10e   :  { %2418 = vmatpush3.bf16.msra.mxu0 %v2800_v13 }
 0x10f   :  { %2419 = vmatprep.subr.bf16.mxu0 %v2801_v42 }
 0x112   :  { %2359 = vmatmul.mubr.msk.bf16.vlgmr.msra.gmra.mxu1 %vm1313_vm0, %v3050_v23  ;;  %2420 = vmatpush3.bf16.msra.mxu0 %v2802_v43  ;;  %v2813_v23 = vld [vmem:[#allocation8 + $0xe8] sm:$0xff]  }
 0x113   :  { %2421 = vmatprep.subr.bf16.mxu0 %v2803_v45  ;;  %2434 = vmatpush3.bf16.msra.mxu1 %v2810_v46 }
 0x114   :  { %2435 = vmatprep.subr.bf16.mxu1 %v2811_v12  ;;  %v327_v12 = vsub.s32 3, %v314_v1 }
 0x116   :  { %2422 = vmatpush3.bf16.msra.mxu0 %v2804_v47 }
 0x117   :  { %2423 = vmatprep.subr.bf16.mxu0 %v2805_v26  ;;  %2436 = vmatpush3.bf16.msra.mxu1 %v2812_v50  ;;  %v323_v50 = vsub.s32 2, %v314_v1 }
 0x118   :  { %2437 = vmatprep.subr.bf16.mxu1 %v2813_v23 }
 0x11a   :  { %2424 = vmatpush3.bf16.msra.mxu0 %v2806_v21 }
 0x11b   :  { %2425 = vmatprep.subr.bf16.mxu0 %v2807_v48  ;;  %2438 = vmatpush3.bf16.msra.mxu1 %v2814_v51 }
 0x11c   :  { %2439 = vmatprep.subr.bf16.mxu1 %v2815_v52 }
 0x11e   :  { %2426 = vmatpush3.bf16.msra.mxu0 %v2808_v49 }
 0x11f   :  { %2440 = vmatpush3.bf16.msra.mxu1 %v2816_v53  ;;  %v328_v53 = vrot.slane %v311_v7, %v327_v12 }
 0x120   :  { %2441 = vmatprep.subr.bf16.mxu1 %v2817_v44  ;;  %v324_v44 = vrot.slane %v311_v7, %v323_v50 }
 0x123   :  { %2442 = vmatpush3.bf16.msra.mxu1 %v2818_v55 }
 0x124   :  { %2443 = vmatprep.subr.bf16.mxu1 %v2819_v56 }
 0x127   :  { %2444 = vmatpush3.bf16.msra.mxu1 %v2820_v57 }
 0x128   :  { %2445 = vmatprep.subr.bf16.mxu1 %v2821_v58 }
 0x12b   :  { %2446 = vmatpush3.bf16.msra.mxu1 %v2822_v59 }
 0x12c   :  { %2447 = vmatprep.subr.bf16.mxu1 %v2823_v60 }
 0x12f   :  { %2448 = vmatpush3.bf16.msra.mxu1 %v2824_v61 }
 0x141   :  { %v1351_v2 = vpop.f32.mrf.mxu0 }
 0x142   :  { %v1394_v62 = vpop.f32.mrf.mxu1  ;;  %v1352_v16 = vadd.f32 %v1351_v2, %v316_v10 }
 0x143   :  { %v1353_v6 = vpop.f32.mrf.mxu0 }
 0x144   :  { %v1396_v0 = vpop.f32.mrf.mxu1  ;;  %v1354_v15 = vadd.f32 %v1353_v6, %v320_v9  ;;  %v1395_v25 = vadd.f32 %v1394_v62, %v1352_v16 }
 0x145   :  { %v1355_v11 = vpop.f32.mrf.mxu0 }
 0x146   :  { %v1398_v3 = vpop.f32.mrf.mxu1  ;;  %v1356_v18 = vadd.f32 %v1355_v11, %v316_v10  ;;  %v1397_v22 = vadd.f32 %v1396_v0, %v1354_v15 }
 0x147   :  { %v1357_v17 = vpop.f32.mrf.mxu0 }
 0x148   :  { %v1400_v8 = vpop.f32.mrf.mxu1  ;;  %v1358_v24 = vadd.f32 %v1357_v17, %v320_v9  ;;  %v1399_v28 = vadd.f32 %v1398_v3, %v1356_v18 }
 0x14a   :  { %v1480_v14 = vpop.f32.mrf.mxu1  ;;  %v1401_v33 = vadd.f32 %v1400_v8, %v1358_v24  ;;  %v2973_v24 = vmov 0.0  }
 0x14b   :  { %2464 = vmatprep.subr.bf16.mxu0 %v2973_v24 }
 0x14c   :  { %v1482_v19 = vpop.f32.mrf.mxu1 }
 0x14e   :  { %v1484_v30 = vpop.f32.mrf.mxu1 }
 0x150   :  { %v1486_v39 = vpop.f32.mrf.mxu1 }
 0x181   :  { %v1437_v20 = vpop.f32.mrf.mxu0 }
 0x182   :  { %v1438_v31 = vadd.f32 %v1437_v20, %v1395_v25  ;;  %v2825_v20 = vld [vmem:[#allocation10 + $0x38] sm:$0xff]  }
 0x183   :  { %v1439_v27 = vpop.f32.mrf.mxu0 }
 0x184   :  { %v1440_v29 = vadd.f32 %v1439_v27, %v1397_v22  ;;  %v1481_v40 = vadd.f32 %v1480_v14, %v1438_v31  ;;  %v2826_v27 = vld [vmem:[#allocation10 + $0x30] sm:$0xff]   ;;  %v2829_v31 = vld [vmem:[#allocation10 + $0x18] sm:$0xff]  }
 0x185   :  { %v1441_v32 = vpop.f32.mrf.mxu0 }
 0x186   :  { %v1442_v34 = vadd.f32 %v1441_v32, %v1399_v28  ;;  %v1483_v36 = vadd.f32 %v1482_v19, %v1440_v29  ;;  %v1661_v45 = vmax.f32 %v1481_v40, 0.0  ;;  %v2827_v29 = vld [vmem:[#allocation10 + $0x28] sm:$0xff]   ;;  %v2830_v32 = vld [vmem:[#allocation10 + $0x10] sm:$0xff]  }
 0x187   :  { %v1443_v35 = vpop.f32.mrf.mxu0 }
 0x188   :  { %v1485_v37 = vadd.f32 %v1484_v30, %v1442_v34  ;;  %v1444_v38 = vadd.f32 %v1443_v35, %v1401_v33  ;;  %v1662_v42 = vmax.f32 %v1483_v36, 0.0  ;;  %v2828_v30 = vld [vmem:[#allocation10 + $0x20] sm:$0xff]   ;;  %v2831_v33 = vld [vmem:[#allocation10 + $0x8] sm:$0xff]  }
 0x189   :  { %v2832_v34 = vld [vmem:[#allocation10] sm:$0xff]  }
 0x18a   :  { %v1487_v41 = vadd.f32 %v1486_v39, %v1444_v38  ;;  %v1665_v13 = vmax.f32 %v1485_v37, 0.0  ;;  %v1523_v47 = vpop.f32.mrf.mxu1 }
 0x18b   :  { %v1524_v60 = vadd.f32 %v1523_v47, %v324_v44 }
 0x18c   :  { %v1666_v43 = vmax.f32 %v1487_v41, 0.0  ;;  %v1669_v46 = vpack.c.bf16 %v1665_v13, %v1661_v45  ;;  %v1525_v26 = vpop.f32.mrf.mxu1  ;;  %v2360_v41 = vld [vmem:[%s3085_s4] ss:$0 sm:$0xff]  ;;  %s2975_s4 = smov [#allocation11]  }
 0x18d   :  { %v1526_v58 = vadd.f32 %v1525_v26, %v328_v53  ;;  %s2148_s8 = sshll.u32 %s2975_s4, 4  ;;  %s2149_s8 = int_to_ptr.vmem [resolvable:$true] %s2148_s8 }
 0x18e   :  { %v1670_v54 = vpack.c.bf16 %v1666_v43, %v1662_v42  ;;  %v1527_v21 = vpop.f32.mrf.mxu1  ;;  %s2933_s9 = scalar_lea.vmem %s2149_s8, 128  ;;  %p2938_p12 = scmp.lt.s32.totalorder %s2149_s8, %s2149_s8 }
 0x18f   :  { %v1528_v59 = vadd.f32 %v1527_v21, %v324_v44  ;;  %p2934_p11 = scmp.ne.s32.totalorder %s2149_s8, %s2933_s9  ;;  %p2939_p13 = scmp.lt.s32.totalorder %s2933_s9, %s2933_s9 }
 0x190   :  { %1968 = vmatprep.mubr.bf16.mxu0 %v1670_v54  ;;  %v1529_v49 = vpop.f32.mrf.mxu1 }
 0x191   :  { %1969 = vmatmul.mubr.bf16.vlgmr.msra.gmra.mxu0 %v1669_v46  ;;  %v1530_v63 = vadd.f32 %v1529_v49, %v328_v53  ;;  %p2940_p0 = por %p2939_p13, %p2938_p12 }
 0x192   :  { %2465 = vmatpush3.bf16.msra.mxu0 %v2825_v20  ;;  %2480 = vmatprep.mubr.msk.bf16.mxu0 %vm2974_vm1, %v2973_v24 }
 0x193   :  { %2466 = vmatprep.subr.bf16.mxu0 %v2973_v24  ;;  %p2941_p1 = pnand %p2940_p0, %p2934_p11 }
 0x196   :  { %2467 = vmatpush3.bf16.msra.mxu0 %v2826_v27 }
 0x197   :  { %2468 = vmatprep.subr.bf16.mxu0 %v2973_v24 }
 0x19a   :  { %2469 = vmatpush3.bf16.msra.mxu0 %v2827_v29 }
 0x19b   :  { %2470 = vmatprep.subr.bf16.mxu0 %v2973_v24 }
 0x19e   :  { %2471 = vmatpush3.bf16.msra.mxu0 %v2828_v30 }
 0x19f   :  { %2472 = vmatprep.subr.bf16.mxu0 %v2973_v24 }
 0x1a2   :  { %2473 = vmatpush3.bf16.msra.mxu0 %v2829_v31 }
 0x1a3   :  { %2474 = vmatprep.subr.bf16.mxu0 %v2973_v24 }
 0x1a6   :  { %2475 = vmatpush3.bf16.msra.mxu0 %v2830_v32 }
 0x1a7   :  { %2476 = vmatprep.subr.bf16.mxu0 %v2973_v24 }
 0x1aa   :  { %2477 = vmatpush3.bf16.msra.mxu0 %v2831_v33 }
 0x1ab   :  { %2478 = vmatprep.subr.bf16.mxu0 %v2973_v24 }
 0x1ae   :  { %2479 = vmatpush3.bf16.msra.mxu0 %v2832_v34 }
 0x1c1   :  { %v1566_v48 = vpop.f32.mrf.mxu0 }
 0x1c2   :  { %v1567_v3 = vadd.f32 %v1566_v48, %v1524_v60 }
 0x1c3   :  { %v1568_v23 = vpop.f32.mrf.mxu0 }
 0x1c4   :  { %v1569_v0 = vadd.f32 %v1568_v23, %v1526_v58 }
 0x1c5   :  { %v1570_v55 = vpop.f32.mrf.mxu0 }
 0x1c6   :  { %v1571_v2 = vadd.f32 %v1570_v55, %v1528_v59 }
 0x1c7   :  { %v1572_v61 = vpop.f32.mrf.mxu0 }
 0x1c8   :  { %v1573_v5 = vadd.f32 %v1572_v61, %v1530_v63 }
 0x1ca   :  { %v1609_v51 = vpop.f32.mrf.mxu1 }
 0x1cb   :  { %v1610_v8 = vadd.f32 %v1609_v51, %v1567_v3  ;;  %v2393_v51 = vld [vmem:[%s3087_s6] ss:$0 sm:$0xff] }
 0x1cc   :  { %v1611_v52 = vpop.f32.mrf.mxu1 }
 0x1cd   :  { %v1612_v1 = vadd.f32 %v1611_v52, %v1569_v0 }
 0x1ce   :  { %v1613_v56 = vpop.f32.mrf.mxu1 }
 0x1cf   :  { %v1614_v6 = vadd.f32 %v1613_v56, %v1571_v2 }
 0x1d0   :  { %v1615_v57 = vpop.f32.mrf.mxu1 }
 0x1d1   :  { %v1616_v10 = vadd.f32 %v1615_v57, %v1573_v5 }
 0x1d2   :  { %v1652_v62 = vpop.f32.mrf.mxu1 }
 0x1d3   :  { %v1653_v14 = vadd.f32 %v1652_v62, %v1610_v8 }
 0x1d4   :  { %v1654_v4 = vpop.f32.mrf.mxu1 }
 0x1d5   :  { %v1655_v7 = vadd.f32 %v1654_v4, %v1612_v1  ;;  %v1663_v22 = vmax.f32 %v1653_v14, 0.0 }
 0x1d6   :  { %v1656_v9 = vpop.f32.mrf.mxu1 }
 0x1d7   :  { %v1657_v11 = vadd.f32 %v1656_v9, %v1614_v6  ;;  %v1664_v18 = vmax.f32 %v1655_v7, 0.0 }
 0x1d8   :  { %v1658_v15 = vpop.f32.mrf.mxu1 }
 0x1d9   :  { %v1659_v16 = vadd.f32 %v1658_v15, %v1616_v10  ;;  %v1667_v17 = vmax.f32 %v1657_v11, 0.0 }
 0x1db   :  { %v1668_v19 = vmax.f32 %v1659_v16, 0.0  ;;  %v1671_v28 = vpack.c.bf16 %v1667_v17, %v1663_v22 }
 0x1dd   :  { %v1672_v25 = vpack.c.bf16 %v1668_v19, %v1664_v18 }
 0x1df   :  { %2009 = vmatprep.mubr.bf16.mxu1 %v1672_v25 }
 0x1e0   :  { %2010 = vmatmul.mubr.bf16.vlgmr.msra.gmra.mxu1 %v1671_v28 }
 0x251   :  { %v2427_v35 = vpop.f32.mrf.mxu0 }
 0x253   :  { %v2428_v36 = vpop.f32.mrf.mxu0 }
 0x254   :  { %v2429_v40 = vadd.f32 %v2428_v36, %v2427_v35 }
 0x255   :  { %v2430_v37 = vpop.f32.mrf.mxu0 }
 0x256   :  { %v1971_v54 = vadd.f32 %v2429_v40, %v2360_v41 }
 0x257   :  { %v2431_v38 = vpop.f32.mrf.mxu0 }
 0x258   :  { %v2432_v42 = vadd.f32 %v2431_v38, %v2430_v37 }
 0x25a   :  { %v1974_v47 = vadd.f32 %v2432_v42, %v2360_v41 }
 0x2a0   :  { %v2449_v39 = vpop.f32.mrf.mxu1 }
 0x2a2   :  { %v2450_v13 = vpop.f32.mrf.mxu1 }
 0x2a3   :  { %v2451_v43 = vadd.f32 %v2450_v13, %v2449_v39 }
 0x2a4   :  { %v2452_v45 = vpop.f32.mrf.mxu1 }
 0x2a5   :  { %v2012_v26 = vadd.f32 %v2451_v43, %v1971_v54 }
 0x2a6   :  { %v2453_v46 = vpop.f32.mrf.mxu1 }
 0x2a7   :  { %v2454_v21 = vadd.f32 %v2453_v46, %v2452_v45  ;;  %v2018_v49 = vmax.f32 %v2012_v26, 0.0 }
 0x2a9   :  { %v2015_v48 = vadd.f32 %v2454_v21, %v1974_v47 }
 0x2ab   :  { %v2019_v12 = vmax.f32 %v2015_v48, 0.0 }
 0x2ad   :  { %v2020_v50 = vpack.c.bf16 %v2019_v12, %v2018_v49 }
 0x2af   :  { %2481 = vmatmul.mubr.bf16.vlgmr.msra.gmra.mxu0 %v2020_v50 }
 0x36f   :  { %v2126_v23 = vpop.f32.mrf.mxu0 }
 0x370   :  { %v2127_v44 = vadd.f32 %v2393_v51, %v2126_v23 }
 0x371   :  { %v2482_v52 = vpop.f32.mrf.mxu0 }
 0x373   :  { %v2129_v53 = vpop.f32.mrf.mxu0 }
 0x374   :  { %v2130_v55 = vadd.f32 %v2393_v51, %v2129_v53 }
 0x375   :  { %v2483_v56 = vpop.f32.mrf.mxu0 }
 0x376   :  { %v2409_v57 = vpack.c.bf16 %v2130_v55, %v2127_v44 }
 0x378   :  { %2410 = vst [vmem:[#allocation11] sm:$0xff] %v2409_v57  }
 0x379   :  { %2944 = shalt.err (!%p2941_p1)
}
 0x37a   :  { %2154 = dma.vmem_to_hbm [thread:$0]  %s2149_s8, 128, %s3088_s7, [#allocation4], %s2965_s11, %s2965_s11, %s2966_s12  }
 0x37b   :  { %2959 = dma.done.wait [#allocation4], 128  }
 0x37c   :  { %2960 = vsyncadd [#allocation4], 4294967168 }
 0x37d   :  { %2158 = vsyncpa [#allocation3], 1 }
 0x37e   :  { %2159 = vsyncpa [#allocation6], 1 }
 0x37f   :  { %2160 = vsyncpa [#allocation9], 1 }
 0x380   :  { %2161 = vsyncpa [#allocation4], 1 }

</bundles_post_ra>
